<compile_context>
chip_gen: v5e
topology: v5e:2x2
jax: 0.10.0
libtpu: 0.0.40
codegen_flags: <defaults>
</compile_context>

<pallas_src>
import math

import jax
import jax.numpy as jnp
from jax.experimental import pallas as pl
from jax.experimental.pallas import tpu as pltpu


def _round_up(x, m):
    return ((x + m - 1) // m) * m


def _pad2d(a, rows, cols):
    a = a.astype(jnp.float32)
    r, c = a.shape
    return jnp.pad(a, ((0, rows - r), (0, cols - c)))


def _nbytes(shape, dtype):
    return math.prod(shape) * jnp.dtype(dtype).itemsize


# ---------------------------------------------------------------------------
# Fused Net forward kernel.
#   grid = (num_layers, num_row_tiles)   (row-major: layers outer, tiles inner)
#   inputs : x_idx (Np,1) i32, bm (Np,1) i32, d_row (Np,1) f32, d_col (Np,1)
#            f32, m (TM,Np) bf16 row tile, emb (Vp,Hp) f32, W (1,Hp,Hp) f32,
#            b (1,1,Hp) f32, Wc (Hp,Hp) f32, bc (1,Hp) f32
#   output : logits_pad (Bp,Hp) f32 (written once, at the last grid step)
#   scratch: h (Np,Hp) f32, x_msg (Np,Hp) bf16   (persist across grid steps)
# ---------------------------------------------------------------------------
def make_net_kernel(num_graphs, b_pad, tm):
    def kernel(xidx_ref, bm_ref, drow_ref, dcol_ref, m_ref, emb_ref,
               w_ref, b_ref, wc_ref, bc_ref, o_ref, h_ref, xmsg_ref):
        l = pl.program_id(0)
        i = pl.program_id(1)
        n_layers = pl.num_programs(0)
        n_tiles = pl.num_programs(1)

        n_pad = h_ref.shape[0]
        vocab_pad = emb_ref.shape[0]
        h_dim = h_ref.shape[1]

        # ---- once (very first grid step): embedding lookup into h scratch.
        # One-hot @ table is gather-free and MXU friendly; note out-of-range
        # ids give a zero row (torch.nn.Embedding would error/clamp).
        @pl.when(jnp.logical_and(l == 0, i == 0))
        def _():
            ids = xidx_ref[...]                                      # (Np,1)
            iota_v = jax.lax.broadcasted_iota(jnp.int32, (n_pad, vocab_pad), 1)
            onehot = (iota_v == ids).astype(jnp.float32)             # (Np,Vp)
            h_ref[...] = jnp.dot(onehot, emb_ref[...],
                                 preferred_element_type=jnp.float32)

        # ---- per-layer prologue (first row tile): full-width x_msg ---------
        # x_msg = relu(h @ W + b) with the column-degree normalisation folded
        # in (no m_norm is ever materialised).  Stored bf16 for the MXU.
        @pl.when(i == 0)
        def _():
            w = w_ref[0]                                             # (Hp,Hp)
            b = b_ref[0]                                             # (1,Hp)
            xm = jnp.dot(h_ref[...], w, preferred_element_type=jnp.float32) + b
            xm = jnp.maximum(xm, 0.0)            # ReLU (dropout p=0 -> id)
            xm = xm * dcol_ref[...]              # fold rsqrt(col degree)
            xmsg_ref[...] = xm.astype(xmsg_ref.dtype)

        # ---- aggregation for this row tile ---------------------------------
        # h[rows] = d_row[rows] * (m_tile @ x_msg);  bf16 x bf16 MXU matmul
        # with f32 accumulation.  Safe to overwrite h: x_msg for this layer
        # was already captured at i == 0.
        row0 = pl.multiple_of(i * tm, tm)
        agg = jnp.dot(m_ref[...], xmsg_ref[...],
                      preferred_element_type=jnp.float32)            # (TM,Hp)
        h_ref[pl.ds(row0, tm), :] = agg * drow_ref[pl.ds(row0, tm), :]

        # ---- epilogue (last grid step): max-pool + classifier --------------
        # Pooled matrix built entirely in registers (no scratch, no partial
        # stores); single lane-dense (Bp,Hp) store to the output.
        @pl.when(jnp.logical_and(l == n_layers - 1, i == n_tiles - 1))
        def _():
            bm = bm_ref[...]                                         # (Np,1)
            h = h_ref[...]                                           # (Np,Hp)
            neg_inf = jnp.float32(-jnp.inf)
            row_ids = jax.lax.broadcasted_iota(jnp.int32, (b_pad, 1), 0)
            pooled = jnp.zeros((b_pad, h_dim), jnp.float32)
            for g in range(num_graphs):                              # static
                gmax = jnp.max(jnp.where(bm == g, h, neg_inf),
                               axis=0, keepdims=True)                # (1,Hp)
                pooled = jnp.where(row_ids == g, gmax, pooled)
            o_ref[...] = jnp.dot(pooled, wc_ref[...],
                                 preferred_element_type=jnp.float32) + bc_ref[...]

    return kernel


# ---------------------------------------------------------------------------
# Wrapper: pad params to lane-dense layouts and launch the fused kernel.
# ---------------------------------------------------------------------------
def net_forward(params, x_idx, m, bm, num_graphs, *, tm=None):
    N = m.shape[0]
    emb = params["embedding"]
    nodes_num, emb_dim = emb.shape
    num_layers = len(params["gcns"])
    num_classes = params["cls_w"].shape[1]

    feat_dims = [emb_dim] + [w.shape[1] for (w, _) in params["gcns"]] + [num_classes]
    h_pad = _round_up(max(feat_dims), 128)
    vocab_pad = _round_up(nodes_num, 128)        # lane-dense one-hot K dim
    b_pad = _round_up(max(num_graphs, 1), 8)

    # Row-tile size: small for toy N (exercise the multi-tile path), 256 for
    # large N so 2x(TM,N) bf16 buffers stay well inside scoped VMEM.
    if tm is None:
        tm = 256 if N >= 512 else 8
    tm = _round_up(tm, 8)
    n_pad = _round_up(max(N, tm), tm)
    n_tiles = n_pad // tm

    # ---- one-time parameter padding (zero pad -> numerically exact) --------
    emb_p = _pad2d(emb, vocab_pad, h_pad)
    w_stack = jnp.stack([_pad2d(w, h_pad, h_pad) for (w, _) in params["gcns"]])
    b_stack = jnp.stack([_pad2d(b, 1, h_pad) for (_, b) in params["gcns"]])
    wc_p = _pad2d(params["cls_w"], h_pad, h_pad)
    bc_p = _pad2d(params["cls_b"], 1, h_pad)

    # ---- inputs -------------------------------------------------------------
    m32 = jnp.pad(m.astype(jnp.float32), ((0, n_pad - N), (0, n_pad - N)))
    # Degree normalisation computed once and folded into activations in the
    # kernel (m_norm never materialised).  Zero-degree guard means padded
    # rows/cols contribute exactly 0 (PyTorch would NaN on a true 0-degree
    # node; the test graphs have self-loops, so results are identical).
    row = jnp.sum(m32, axis=1, keepdims=True)
    col = jnp.sum(m32, axis=0, keepdims=True).T
    d_row = jnp.where(row > 0, jax.lax.rsqrt(row), 0.0).astype(jnp.float32)
    d_col = jnp.where(col > 0, jax.lax.rsqrt(col), 0.0).astype(jnp.float32)
    # Adjacency streamed/stored in bf16: exact for {0,1} entries, halves HBM
    # bytes and VMEM for the dominant N^2 operand; accumulation stays f32.
    m_bf16 = m32.astype(jnp.bfloat16)

    xidx2d = jnp.pad(x_idx.reshape(N, 1).astype(jnp.int32),
                     ((0, n_pad - N), (0, 0)))
    bm2d = jnp.pad(bm.reshape(N, 1).astype(jnp.int32),
                   ((0, n_pad - N), (0, 0)), constant_values=-1)  # never pooled

    in_specs = [
        pl.BlockSpec((n_pad, 1), lambda l, i: (0, 0)),            # x_idx
        pl.BlockSpec((n_pad, 1), lambda l, i: (0, 0)),            # bm
        pl.BlockSpec((n_pad, 1), lambda l, i: (0, 0)),            # d_row
        pl.BlockSpec((n_pad, 1), lambda l, i: (0, 0)),            # d_col
        pl.BlockSpec((tm, n_pad), lambda l, i: (i, 0)),           # adjacency tile
        pl.BlockSpec((vocab_pad, h_pad), lambda l, i: (0, 0)),    # emb table
        pl.BlockSpec((1, h_pad, h_pad), lambda l, i: (l, 0, 0)),  # layer W
        pl.BlockSpec((1, 1, h_pad), lambda l, i: (l, 0, 0)),      # layer b
        pl.BlockSpec((h_pad, h_pad), lambda l, i: (0, 0)),        # classifier W
        pl.BlockSpec((1, h_pad), lambda l, i: (0, 0)),            # classifier b
    ]
    out_spec = pl.BlockSpec((b_pad, h_pad), lambda l, i: (0, 0))

    scratch_shapes = [
        pltpu.VMEM((n_pad, h_pad), jnp.float32),    # activations h (all nodes)
        pltpu.VMEM((n_pad, h_pad), jnp.bfloat16),   # per-layer x_msg (all nodes)
    ]

    # Explicit scoped-VMEM budget sized from the actual buffers (+ headroom).
    vmem_need = (
        2 * _nbytes((tm, n_pad), jnp.bfloat16)              # double-buffered m
        + 2 * _nbytes((1, h_pad, h_pad), jnp.float32)       # layer W (per l)
        + 2 * _nbytes((1, 1, h_pad), jnp.float32)
        + 2 * _nbytes((n_pad, 1), jnp.int32)
        + 2 * _nbytes((n_pad, 1), jnp.float32)
        + _nbytes((vocab_pad, h_pad), jnp.float32)
        + _nbytes((h_pad, h_pad), jnp.float32)
        + _nbytes((1, h_pad), jnp.float32)
        + _nbytes((b_pad, h_pad), jnp.float32)
        + _nbytes((n_pad, h_pad), jnp.float32)
        + _nbytes((n_pad, h_pad), jnp.bfloat16)
    )
    vmem_limit = int(min(100 * 1024 * 1024,
                         max(8 * 1024 * 1024, 2 * vmem_need + (1 << 20))))

    out_pad = pl.pallas_call(
        make_net_kernel(num_graphs, b_pad, tm),
        out_shape=jax.ShapeDtypeStruct((b_pad, h_pad), jnp.float32),
        grid=(num_layers, n_tiles),
        in_specs=in_specs,
        out_specs=out_spec,
        scratch_shapes=scratch_shapes,
        compiler_params=pltpu.CompilerParams(
            # both axes carry cross-iteration scratch dependencies
            dimension_semantics=("arbitrary", "arbitrary"),
            vmem_limit_bytes=vmem_limit,
        ),
    )(xidx2d, bm2d, d_row, d_col, m_bf16, emb_p, w_stack, b_stack, wc_p, bc_p)

    return out_pad[:num_graphs, :num_classes]


# ---------------------------------------------------------------------------
# pure-JAX reference (literal translation of the PyTorch forward)
# ---------------------------------------------------------------------------
def net_forward_ref(params, x_idx, m, bm, num_graphs):
    out = params["embedding"][x_idx]
    for (w, b) in params["gcns"]:
        msg = jnp.maximum(out @ w + b, 0.0)
        row = jnp.sum(m, axis=1, keepdims=True)
        col = jnp.sum(m, axis=0, keepdims=True)
        deg = jnp.sqrt(row) @ jnp.sqrt(col)
        out = (m / deg) @ msg
    pooled = []
    for i in range(num_graphs):
        mask = (bm == i)[:, None]
        pooled.append(jnp.max(jnp.where(mask, out, -jnp.inf), axis=0))
    pooled = jnp.stack(pooled, axis=0)
    return pooled @ params["cls_w"] + params["cls_b"]


if __name__ == "__main__":
    # small shapes consistent with the module
    nodes_num = 20          # embedding vocab size
    embedding_dim = 8
    hidden_dims = [32, 16]
    num_classes = 4
    N = 16                  # total nodes across the batch of graphs
    num_graphs = 3          # "batch_size" of graphs

    key = jax.random.PRNGKey(0)
    k_emb, k_m, k_idx, *k_layers = jax.random.split(key, 3 + 2 * (len(hidden_dims) + 1))

    # deterministic parameter init
    params = {}
    params["embedding"] = (jax.random.normal(k_emb, (nodes_num, embedding_dim),
                                             dtype=jnp.float32) * 0.1)
    gcns = []
    in_dim = embedding_dim
    ki = 0
    for d in hidden_dims:
        w = jax.random.normal(k_layers[ki], (in_dim, d), dtype=jnp.float32) * 0.1
        b = jax.random.normal(k_layers[ki + 1], (1, d), dtype=jnp.float32) * 0.1
        gcns.append((w, b))
        in_dim = d
        ki += 2
    params["gcns"] = gcns
    params["cls_w"] = jax.random.normal(k_layers[ki], (in_dim, num_classes),
                                        dtype=jnp.float32) * 0.1
    params["cls_b"] = jax.random.normal(k_layers[ki + 1], (1, num_classes),
                                        dtype=jnp.float32) * 0.1

    # inputs: node indices, adjacency (symmetric, self-loops -> nonzero degrees),
    # and graph membership vector
    x_idx = jax.random.randint(k_idx, (N,), 0, nodes_num)
    a = (jax.random.uniform(k_m, (N, N)) < 0.3).astype(jnp.float32)
    m = jnp.clip(a + a.T + jnp.eye(N, dtype=jnp.float32), 0.0, 1.0)
    bm = jnp.array([0] * 6 + [1] * 5 + [2] * 5, dtype=jnp.int32)

    # tm=8 -> 2 row tiles, exercises the tiled grid path at toy size
    logits = net_forward(params, x_idx, m, bm, num_graphs, tm=8)
    jax.block_until_ready(logits)

    ref = net_forward_ref(params, x_idx, m, bm, num_graphs)
    assert logits.shape == (num_graphs, num_classes)
    # bf16 x_msg in the aggregation matmul (f32 accumulation) -> slightly
    # looser tolerance than a pure-f32 path.
    assert jnp.allclose(logits, ref, atol=2e-3, rtol=1e-2)

    print("KERNEL_OK")
</pallas_src>

<mosaic_0001>
module attributes {stable_mosaic.version = 11 : i64} {
  func.func @kernel(%arg0: i32, %arg1: i32, %arg2: memref<16x1xi32, #tpu.memory_space<vmem>>, %arg3: memref<16x1xi32, #tpu.memory_space<vmem>>, %arg4: memref<16x1xf32, #tpu.memory_space<vmem>>, %arg5: memref<16x1xf32, #tpu.memory_space<vmem>>, %arg6: memref<8x16xbf16, #tpu.memory_space<vmem>>, %arg7: memref<128x128xf32, #tpu.memory_space<vmem>>, %arg8: memref<1x128x128xf32, #tpu.memory_space<vmem>>, %arg9: memref<1x1x128xf32, #tpu.memory_space<vmem>>, %arg10: memref<128x128xf32, #tpu.memory_space<vmem>>, %arg11: memref<1x128xf32, #tpu.memory_space<vmem>>, %arg12: memref<8x128xf32, #tpu.memory_space<vmem>>, %arg13: memref<16x128xf32, #tpu.memory_space<vmem>>, %arg14: memref<16x128xbf16, #tpu.memory_space<vmem>>) attributes {dimension_semantics = [#tpu.dimension_semantics<arbitrary>, #tpu.dimension_semantics<arbitrary>], iteration_bounds = array<i64: 2, 2>, scalar_prefetch = 0 : i64, scratch_operands = 2 : i64, tpu.core_type = #tpu.core_type<tc>, window_params = [{pipeline_mode = #tpu.pipeline_mode<synchronous>, transform_indices = @transform_0, window_bounds = array<i64: 16, 1>}, {pipeline_mode = #tpu.pipeline_mode<synchronous>, transform_indices = @transform_1, window_bounds = array<i64: 16, 1>}, {pipeline_mode = #tpu.pipeline_mode<synchronous>, transform_indices = @transform_2, window_bounds = array<i64: 16, 1>}, {pipeline_mode = #tpu.pipeline_mode<synchronous>, transform_indices = @transform_3, window_bounds = array<i64: 16, 1>}, {transform_indices = @transform_4, window_bounds = array<i64: 8, 16>}, {pipeline_mode = #tpu.pipeline_mode<synchronous>, transform_indices = @transform_5, window_bounds = array<i64: 128, 128>}, {transform_indices = @transform_6, window_bounds = array<i64: 1, 128, 128>}, {transform_indices = @transform_7, window_bounds = array<i64: 1, 1, 128>}, {pipeline_mode = #tpu.pipeline_mode<synchronous>, transform_indices = @transform_8, window_bounds = array<i64: 128, 128>}, {pipeline_mode = #tpu.pipeline_mode<synchronous>, transform_indices = @transform_9, window_bounds = array<i64: 1, 128>}, {pipeline_mode = #tpu.pipeline_mode<synchronous>, transform_indices = @transform_10, window_bounds = array<i64: 8, 128>}]} {
    %c0_i32 = arith.constant 0 : i32
    %0 = arith.cmpi eq, %arg0, %c0_i32 : i32
    %c0_i32_0 = arith.constant 0 : i32
    %1 = arith.cmpi eq, %arg1, %c0_i32_0 : i32
    %2 = arith.andi %0, %1 : i1
    %3 = arith.extui %2 : i1 to i32
    %c0_i32_1 = arith.constant 0 : i32
    %4 = arith.cmpi ne, %3, %c0_i32_1 : i32
    scf.if %4 {
      %c0_11 = arith.constant 0 : index
      %c0_12 = arith.constant 0 : index
      %24 = vector.load %arg2[%c0_11, %c0_12] : memref<16x1xi32, #tpu.memory_space<vmem>>, vector<16x1xi32>
      %25 = tpu.iota {dimensions = array<i32: 1>} : vector<16x128xi32>
      %26 = vector.broadcast %24 : vector<16x1xi32> to vector<16x128xi32>
      %27 = arith.cmpi eq, %25, %26 : vector<16x128xi32>
      %28 = arith.extui %27 : vector<16x128xi1> to vector<16x128xi32>
      %29 = arith.sitofp %28 : vector<16x128xi32> to vector<16x128xf32>
      %c0_13 = arith.constant 0 : index
      %c0_14 = arith.constant 0 : index
      %30 = vector.load %arg7[%c0_13, %c0_14] : memref<128x128xf32, #tpu.memory_space<vmem>>, vector<128x128xf32>
      %cst_15 = arith.constant dense<0.000000e+00> : vector<16x128xf32>
      %31 = tpu.matmul %29, %30, %cst_15 {dimension_numbers = #tpu.dot_dimension_numbers<[1], [0], [0], [1], [0, 0, 1, 1], [], []>} : vector<16x128xf32>, vector<128x128xf32>, vector<16x128xf32> -> vector<16x128xf32>
      %c0_16 = arith.constant 0 : index
      %c0_17 = arith.constant 0 : index
      %32 = vector.load %arg13[%c0_16, %c0_17] : memref<16x128xf32, #tpu.memory_space<vmem>>, vector<16x128xf32>
      tpu.vector_store %arg13[%c0_16, %c0_17], %31 {strides = array<i32>} : memref<16x128xf32, #tpu.memory_space<vmem>>, vector<16x128xf32>,
    } else {
    }
    %c0_i32_2 = arith.constant 0 : i32
    %5 = arith.cmpi eq, %arg1, %c0_i32_2 : i32
    %6 = arith.extui %5 : i1 to i32
    %c0_i32_3 = arith.constant 0 : i32
    %7 = arith.cmpi ne, %6, %c0_i32_3 : i32
    scf.if %7 {
      %c0_11 = arith.constant 0 : index
      %c0_12 = arith.constant 0 : index
      %c0_13 = arith.constant 0 : index
      %24 = vector.load %arg8[%c0_11, %c0_12, %c0_13] : memref<1x128x128xf32, #tpu.memory_space<vmem>>, vector<1x128x128xf32>
      %25 = vector.shape_cast %24 : vector<1x128x128xf32> to vector<128x128xf32>
      %c0_14 = arith.constant 0 : index
      %c0_15 = arith.constant 0 : index
      %c0_16 = arith.constant 0 : index
      %26 = vector.load %arg9[%c0_14, %c0_15, %c0_16] : memref<1x1x128xf32, #tpu.memory_space<vmem>>, vector<1x1x128xf32>
      %27 = vector.shape_cast %26 : vector<1x1x128xf32> to vector<1x128xf32>
      %c0_17 = arith.constant 0 : index
      %c0_18 = arith.constant 0 : index
      %28 = vector.load %arg13[%c0_17, %c0_18] : memref<16x128xf32, #tpu.memory_space<vmem>>, vector<16x128xf32>
      %cst_19 = arith.constant dense<0.000000e+00> : vector<16x128xf32>
      %29 = tpu.matmul %28, %25, %cst_19 {dimension_numbers = #tpu.dot_dimension_numbers<[1], [0], [0], [1], [0, 0, 1, 1], [], []>} : vector<16x128xf32>, vector<128x128xf32>, vector<16x128xf32> -> vector<16x128xf32>
      %30 = vector.broadcast %27 : vector<1x128xf32> to vector<16x128xf32>
      %31 = arith.addf %29, %30 : vector<16x128xf32>
      %cst_20 = arith.constant 0.000000e+00 : f32
      %32 = vector.broadcast %cst_20 : f32 to vector<16x128xf32>
      %33 = arith.maximumf %31, %32 : vector<16x128xf32>
      %c0_21 = arith.constant 0 : index
      %c0_22 = arith.constant 0 : index
      %34 = vector.load %arg5[%c0_21, %c0_22] : memref<16x1xf32, #tpu.memory_space<vmem>>, vector<16x1xf32>
      %35 = vector.broadcast %34 : vector<16x1xf32> to vector<16x128xf32>
      %36 = arith.mulf %33, %35 : vector<16x128xf32>
      %37 = arith.truncf %36 : vector<16x128xf32> to vector<16x128xbf16>
      %c0_23 = arith.constant 0 : index
      %c0_24 = arith.constant 0 : index
      %38 = vector.load %arg14[%c0_23, %c0_24] : memref<16x128xbf16, #tpu.memory_space<vmem>>, vector<16x128xbf16>
      tpu.vector_store %arg14[%c0_23, %c0_24], %37 {strides = array<i32>} : memref<16x128xbf16, #tpu.memory_space<vmem>>, vector<16x128xbf16>,
    } else {
    }
    %c8_i32 = arith.constant 8 : i32
    %8 = arith.muli %arg1, %c8_i32 : i32
    %9 = tpu.assume_multiple %8, 8 : i32
    %c0 = arith.constant 0 : index
    %c0_4 = arith.constant 0 : index
    %10 = vector.load %arg6[%c0, %c0_4] : memref<8x16xbf16, #tpu.memory_space<vmem>>, vector<8x16xbf16>
    %c0_5 = arith.constant 0 : index
    %c0_6 = arith.constant 0 : index
    %11 = vector.load %arg14[%c0_5, %c0_6] : memref<16x128xbf16, #tpu.memory_space<vmem>>, vector<16x128xbf16>
    %cst = arith.constant dense<0.000000e+00> : vector<8x128xf32>
    %12 = tpu.matmul %10, %11, %cst {dimension_numbers = #tpu.dot_dimension_numbers<[1], [0], [0], [1], [0, 0, 1, 1], [], []>} : vector<8x16xbf16>, vector<16x128xbf16>, vector<8x128xf32> -> vector<8x128xf32>
    %13 = arith.index_cast %9 : i32 to index
    %c0_7 = arith.constant 0 : index
    %14 = vector.load %arg4[%13, %c0_7] : memref<16x1xf32, #tpu.memory_space<vmem>>, vector<8x1xf32>
    %15 = vector.broadcast %14 : vector<8x1xf32> to vector<8x128xf32>
    %16 = arith.mulf %12, %15 : vector<8x128xf32>
    %17 = arith.index_cast %9 : i32 to index
    %c0_8 = arith.constant 0 : index
    %18 = vector.load %arg13[%17, %c0_8] : memref<16x128xf32, #tpu.memory_space<vmem>>, vector<8x128xf32>
    tpu.vector_store %arg13[%17, %c0_8], %16 {strides = array<i32>} : memref<16x128xf32, #tpu.memory_space<vmem>>, vector<8x128xf32>,
    %c1_i32 = arith.constant 1 : i32
    %19 = arith.cmpi eq, %arg0, %c1_i32 : i32
    %c1_i32_9 = arith.constant 1 : i32
    %20 = arith.cmpi eq, %arg1, %c1_i32_9 : i32
    %21 = arith.andi %19, %20 : i1
    %22 = arith.extui %21 : i1 to i32
    %c0_i32_10 = arith.constant 0 : i32
    %23 = arith.cmpi ne, %22, %c0_i32_10 : i32
    scf.if %23 {
      %c0_11 = arith.constant 0 : index
      %c0_12 = arith.constant 0 : index
      %24 = vector.load %arg3[%c0_11, %c0_12] : memref<16x1xi32, #tpu.memory_space<vmem>>, vector<16x1xi32>
      %c0_13 = arith.constant 0 : index
      %c0_14 = arith.constant 0 : index
      %25 = vector.load %arg13[%c0_13, %c0_14] : memref<16x128xf32, #tpu.memory_space<vmem>>, vector<16x128xf32>
      %26 = tpu.iota {dimensions = array<i32: 0>} : vector<8x1xi32>
      %cst_15 = arith.constant 0.000000e+00 : f32
      %27 = vector.broadcast %cst_15 : f32 to vector<8x128xf32>
      %c0_i32_16 = arith.constant 0 : i32
      %28 = vector.broadcast %c0_i32_16 : i32 to vector<16x1xi32>
      %29 = arith.cmpi eq, %24, %28 : vector<16x1xi32>
      %cst_17 = arith.constant 0xFF800000 : f32
      %30 = vector.shape_cast %29 : vector<16x1xi1> to vector<16x1xi1>
      %31 = vector.broadcast %30 : vector<16x1xi1> to vector<16x128xi1>
      %32 = vector.broadcast %cst_17 : f32 to vector<16x128xf32>
      %33 = arith.select %31, %25, %32 : vector<16x128xi1>, vector<16x128xf32>
      %cst_18 = arith.constant dense<0xFF800000> : vector<128xf32>
      %34 = vector.multi_reduction <maximumf>, %33, %cst_18 [0] : vector<16x128xf32> to vector<128xf32>
      %35 = vector.shape_cast %34 : vector<128xf32> to vector<1x128xf32>
      %c0_i32_19 = arith.constant 0 : i32
      %36 = vector.broadcast %c0_i32_19 : i32 to vector<8x1xi32>
      %37 = arith.cmpi eq, %26, %36 : vector<8x1xi32>
      %38 = vector.shape_cast %37 : vector<8x1xi1> to vector<8x1xi1>
      %39 = vector.broadcast %38 : vector<8x1xi1> to vector<8x128xi1>
      %40 = vector.shape_cast %35 : vector<1x128xf32> to vector<1x128xf32>
      %41 = vector.broadcast %40 : vector<1x128xf32> to vector<8x128xf32>
      %42 = arith.select %39, %41, %27 : vector<8x128xi1>, vector<8x128xf32>
      %c1_i32_20 = arith.constant 1 : i32
      %43 = vector.broadcast %c1_i32_20 : i32 to vector<16x1xi32>
      %44 = arith.cmpi eq, %24, %43 : vector<16x1xi32>
      %cst_21 = arith.constant 0xFF800000 : f32
      %45 = vector.shape_cast %44 : vector<16x1xi1> to vector<16x1xi1>
      %46 = vector.broadcast %45 : vector<16x1xi1> to vector<16x128xi1>
      %47 = vector.broadcast %cst_21 : f32 to vector<16x128xf32>
      %48 = arith.select %46, %25, %47 : vector<16x128xi1>, vector<16x128xf32>
      %cst_22 = arith.constant dense<0xFF800000> : vector<128xf32>
      %49 = vector.multi_reduction <maximumf>, %48, %cst_22 [0] : vector<16x128xf32> to vector<128xf32>
      %50 = vector.shape_cast %49 : vector<128xf32> to vector<1x128xf32>
      %c1_i32_23 = arith.constant 1 : i32
      %51 = vector.broadcast %c1_i32_23 : i32 to vector<8x1xi32>
      %52 = arith.cmpi eq, %26, %51 : vector<8x1xi32>
      %53 = vector.shape_cast %52 : vector<8x1xi1> to vector<8x1xi1>
      %54 = vector.broadcast %53 : vector<8x1xi1> to vector<8x128xi1>
      %55 = vector.shape_cast %50 : vector<1x128xf32> to vector<1x128xf32>
      %56 = vector.broadcast %55 : vector<1x128xf32> to vector<8x128xf32>
      %57 = arith.select %54, %56, %42 : vector<8x128xi1>, vector<8x128xf32>
      %c2_i32 = arith.constant 2 : i32
      %58 = vector.broadcast %c2_i32 : i32 to vector<16x1xi32>
      %59 = arith.cmpi eq, %24, %58 : vector<16x1xi32>
      %cst_24 = arith.constant 0xFF800000 : f32
      %60 = vector.shape_cast %59 : vector<16x1xi1> to vector<16x1xi1>
      %61 = vector.broadcast %60 : vector<16x1xi1> to vector<16x128xi1>
      %62 = vector.broadcast %cst_24 : f32 to vector<16x128xf32>
      %63 = arith.select %61, %25, %62 : vector<16x128xi1>, vector<16x128xf32>
      %cst_25 = arith.constant dense<0xFF800000> : vector<128xf32>
      %64 = vector.multi_reduction <maximumf>, %63, %cst_25 [0] : vector<16x128xf32> to vector<128xf32>
      %65 = vector.shape_cast %64 : vector<128xf32> to vector<1x128xf32>
      %c2_i32_26 = arith.constant 2 : i32
      %66 = vector.broadcast %c2_i32_26 : i32 to vector<8x1xi32>
      %67 = arith.cmpi eq, %26, %66 : vector<8x1xi32>
      %68 = vector.shape_cast %67 : vector<8x1xi1> to vector<8x1xi1>
      %69 = vector.broadcast %68 : vector<8x1xi1> to vector<8x128xi1>
      %70 = vector.shape_cast %65 : vector<1x128xf32> to vector<1x128xf32>
      %71 = vector.broadcast %70 : vector<1x128xf32> to vector<8x128xf32>
      %72 = arith.select %69, %71, %57 : vector<8x128xi1>, vector<8x128xf32>
      %c0_27 = arith.constant 0 : index
      %c0_28 = arith.constant 0 : index
      %73 = vector.load %arg10[%c0_27, %c0_28] : memref<128x128xf32, #tpu.memory_space<vmem>>, vector<128x128xf32>
      %cst_29 = arith.constant dense<0.000000e+00> : vector<8x128xf32>
      %74 = tpu.matmul %72, %73, %cst_29 {dimension_numbers = #tpu.dot_dimension_numbers<[1], [0], [0], [1], [0, 0, 1, 1], [], []>} : vector<8x128xf32>, vector<128x128xf32>, vector<8x128xf32> -> vector<8x128xf32>
      %c0_30 = arith.constant 0 : index
      %c0_31 = arith.constant 0 : index
      %75 = vector.load %arg11[%c0_30, %c0_31] : memref<1x128xf32, #tpu.memory_space<vmem>>, vector<1x128xf32>
      %76 = vector.broadcast %75 : vector<1x128xf32> to vector<8x128xf32>
      %77 = arith.addf %74, %76 : vector<8x128xf32>
      %c0_32 = arith.constant 0 : index
      %c0_33 = arith.constant 0 : index
      %78 = vector.load %arg12[%c0_32, %c0_33] : memref<8x128xf32, #tpu.memory_space<vmem>>, vector<8x128xf32>
      tpu.vector_store %arg12[%c0_32, %c0_33], %77 {strides = array<i32>} : memref<8x128xf32, #tpu.memory_space<vmem>>, vector<8x128xf32>,
    } else {
    }
    return
  }
  func.func @transform_0(%arg0: i32, %arg1: i32) -> (i32, i32) {
    %c0_i32 = arith.constant 0 : i32
    %c0_i32_0 = arith.constant 0 : i32
    %c0_i32_1 = arith.constant 0 : i32
    return %c0_i32, %c0_i32_0 : i32, i32
  }
  func.func @transform_1(%arg0: i32, %arg1: i32) -> (i32, i32) {
    %c0_i32 = arith.constant 0 : i32
    %c0_i32_0 = arith.constant 0 : i32
    %c0_i32_1 = arith.constant 0 : i32
    return %c0_i32, %c0_i32_0 : i32, i32
  }
  func.func @transform_2(%arg0: i32, %arg1: i32) -> (i32, i32) {
    %c0_i32 = arith.constant 0 : i32
    %c0_i32_0 = arith.constant 0 : i32
    %c0_i32_1 = arith.constant 0 : i32
    return %c0_i32, %c0_i32_0 : i32, i32
  }
  func.func @transform_3(%arg0: i32, %arg1: i32) -> (i32, i32) {
    %c0_i32 = arith.constant 0 : i32
    %c0_i32_0 = arith.constant 0 : i32
    %c0_i32_1 = arith.constant 0 : i32
    return %c0_i32, %c0_i32_0 : i32, i32
  }
  func.func @transform_4(%arg0: i32, %arg1: i32) -> (i32, i32) {
    %c0_i32 = arith.constant 0 : i32
    %c0_i32_0 = arith.constant 0 : i32
    return %arg1, %c0_i32 : i32, i32
  }
  func.func @transform_5(%arg0: i32, %arg1: i32) -> (i32, i32) {
    %c0_i32 = arith.constant 0 : i32
    %c0_i32_0 = arith.constant 0 : i32
    %c0_i32_1 = arith.constant 0 : i32
    return %c0_i32, %c0_i32_0 : i32, i32
  }
  func.func @transform_6(%arg0: i32, %arg1: i32) -> (i32, i32, i32) {
    %c0_i32 = arith.constant 0 : i32
    %c0_i32_0 = arith.constant 0 : i32
    %c0_i32_1 = arith.constant 0 : i32
    return %arg0, %c0_i32, %c0_i32_0 : i32, i32, i32
  }
  func.func @transform_7(%arg0: i32, %arg1: i32) -> (i32, i32, i32) {
    %c0_i32 = arith.constant 0 : i32
    %c0_i32_0 = arith.constant 0 : i32
    %c0_i32_1 = arith.constant 0 : i32
    return %arg0, %c0_i32, %c0_i32_0 : i32, i32, i32
  }
  func.func @transform_8(%arg0: i32, %arg1: i32) -> (i32, i32) {
    %c0_i32 = arith.constant 0 : i32
    %c0_i32_0 = arith.constant 0 : i32
    %c0_i32_1 = arith.constant 0 : i32
    return %c0_i32, %c0_i32_0 : i32, i32
  }
  func.func @transform_9(%arg0: i32, %arg1: i32) -> (i32, i32) {
    %c0_i32 = arith.constant 0 : i32
    %c0_i32_0 = arith.constant 0 : i32
    %c0_i32_1 = arith.constant 0 : i32
    return %c0_i32, %c0_i32_0 : i32, i32
  }
  func.func @transform_10(%arg0: i32, %arg1: i32) -> (i32, i32) {
    %c0_i32 = arith.constant 0 : i32
    %c0_i32_0 = arith.constant 0 : i32
    %c0_i32_1 = arith.constant 0 : i32
    return %c0_i32, %c0_i32_0 : i32, i32
  }
}

</mosaic_0001>

<bundles_post_ra>
// kernel: tpu_custom_call.1
= control target key start
LH: loop header
LB: loop body
LE: loop exit
PB: predicated region body
PF: predicated region fallthrough
CT: control target
= control target key end

     0   :  { %s1520_s0 = inlined_call_operand.vmem [shape: s32[16,1], index: 0, kind: input, shape index: {}]   ;;  %s1521_s1 = inlined_call_operand.vmem [shape: s32[16,1], index: 1, kind: input, shape index: {}]   ;;  %s1522_s2 = inlined_call_operand.vmem [shape: f32[16,1], index: 2, kind: input, shape index: {}]   ;;  %s1523_s3 = inlined_call_operand.vmem [shape: f32[16,1], index: 3, kind: input, shape index: {}]   ;;  %s1524_s4 = inlined_call_operand.vmem [shape: bf16[16,16], index: 4, kind: input, shape index: {}]   ;;  %s1525_s5 = inlined_call_operand.hbm [shape: f32[128,128], index: 5, kind: input, shape index: {}]   ;;  %s1526_s6 = inlined_call_operand.hbm [shape: f32[2,128,128], index: 6, kind: input, shape index: {}]   ;;  %s1527_s7 = inlined_call_operand.vmem [shape: f32[2,1,128], index: 7, kind: input, shape index: {}]   ;;  %s1528_s8 = inlined_call_operand.hbm [shape: f32[128,128], index: 8, kind: input, shape index: {}]   ;;  %s1529_s9 = inlined_call_operand.vmem [shape: f32[1,128], index: 9, kind: input, shape index: {}]   ;;  %s1530_s10 = inlined_call_operand.hbm [shape: f32[8,128], index: 10, kind: output, shape index: {}]  }
   0x1   :  { %1535 = sst [smem:[#allocation17_spill]] %s1521_s1 }
   0x2   :  { %1536 = sst [smem:[#allocation18_spill]] %s1522_s2 }
   0x3   :  { %1537 = sst [smem:[#allocation19_spill]] %s1525_s5 }
   0x4   :  { %1538 = sst [smem:[#allocation20_spill]] %s1528_s8 }
   0x5   :  { %1539 = sst [smem:[#allocation21_spill]] %s1529_s9 }
   0x6   :  { %1540 = sst [smem:[#allocation22_spill]] %s1530_s10 }
   0x7   :  { %15 = vsyncpa [#allocation5], 0 }
   0x8   :  { %16 = vsyncpa [#allocation8], 0 }
   0x9   :  { %18 = vsyncpa [#allocation8 + $0x1], 0 }
   0xa   :  { %19 = vsyncpa [#allocation6], 0  ;;  %s1302_s13 = smov 0   ;;  %s1304_s14 = smov 0  }
   0xb   :  { %s1306_s15 = smov 0   ;;  %s1308_s16 = smov 0  }
   0xc   :  { %s1310_s17 = smov 0   ;;  %s1312_s18 = smov 0  }
   0xd   :  { %s1314_s19 = smov 0   ;;  %s1316_s20 = smov 0  }
   0xe LB: > { %1541 = sst [smem:[#allocation15_spill]] %s1227_s18  ;;  %s1341_s21 = sadd.s32 4294967295, %s1235_s20   ;;  %s1235_s20 = sphi %s1316_s20, %s25_s20   ;;  %s1231_s19 = sphi %s1314_s19, %s1561_s19   ;;  %s1227_s18 = sphi %s1312_s18, %s1556_s18   ;;  %s1223_s17 = sphi %s1310_s17, %s1560_s17   ;;  %s1219_s16 = sphi %s1308_s16, %s1555_s16   ;;  %s1215_s15 = sphi %s1306_s15, %s1559_s15   ;;  %s1211_s14 = sphi %s1304_s14, %s1558_s14   ;;  %s1207_s13 = sphi %s1302_s13, %s1557_s13  }
   0xf   : > { %p188_p0 = scmp.ne.s32.totalorder %s1211_s14, %s1207_s13  ;;  %p189_p1 = scmp.eq.s32.totalorder %s1341_s21, 0 }
  0x10   : > { %p859_p2 = scmp.ge.s32.totalorder %s1235_s20, 1  ;;  %p288_p3 = scmp.lt.s32.totalorder %s1235_s20, 5 }
  0x11   : > { %p1349_p4 = por %p189_p1, %p188_p0  ;;  %s1544_s8 = sld [smem:[#allocation20_spill]] }
  0x12   : > { %p1353_p5 = pnand %p859_p2, %p288_p3  ;;  %s1237_s27 = smov [#allocation9]  }
  0x13   : > { %s327_s28 = sshll.u32 %s1237_s27, 4  ;;  %s1531_s29 = smov 128   ;;  %s328_s28 = int_to_ptr.vmem [resolvable:$true] %s327_s28 }
  0x14   : > { %p939_p6 = pneg %p1353_p5  ;;  %s1532_s30 = smov 8  }
  0x15   : > { %s1545_s5 = sld [smem:[#allocation19_spill]]  ;;  %s1240_s24 = smov [#allocation4]  }
  0x16   : > { %p940_p7 = pnand %p939_p6, %p189_p1  ;;  %s313_s25 = sshll.u32 %s1240_s24, 4  ;;  %s314_s25 = int_to_ptr.vmem [resolvable:$true] %s313_s25 }
  0x17   : > { %s325_s26 = sshll.u32 %s1544_s8, 4  ;;  %s34_s27 = sadd.s32 1, %s1227_s18  ;;  %s326_s26 = int_to_ptr.hbm [resolvable:$true] %s325_s26 }
  0x18   : > { %945 = dma.hbm_to_vmem [thread:$0]  (!%p940_p7), %s326_s26, 2048, %s328_s28, [#allocation8], %s1531_s29, %s1531_s29, %s1532_s30  }
  0x19   : > { %p35_p8 = scmp.ge.s32.totalorder %s34_s27, 2  ;;  %s37_s26 = sadd.s32 1, %s1231_s19 }
  0x1a   : > { %p182_p9 = scmp.ne.s32.totalorder %s1215_s15, %s1211_s14  ;;  %p183_p10 = scmp.eq.s32.totalorder %s1235_s20, 0 }
  0x1b   : > { %s311_s13 = sshll.u32 %s1545_s5, 4  ;;  %s1563_s27 = smov (%p35_p8, %s34_s27), 0  ;;  %s312_s13 = int_to_ptr.hbm [resolvable:$true] %s311_s13 }
  0x1c   : > { %942 = dma.hbm_to_vmem [thread:$0]  (!%p940_p7), %s312_s13, 2048, %s314_s25, [#allocation5], %s1531_s29, %s1531_s29, %s1532_s30  }
  0x1d   : > { %1546 = sst [smem:[#allocation16_spill]] %s1563_s27  ;;  %s1565_s26 = smov (!%p35_p8, %s37_s26), %s1231_s19 }
  0x1e   : > { %s175_s28 = sadd.s32 1, %s1215_s15  ;;  %p1382_p11 = por %p183_p10, %p182_p9 }
  0x1f   : > { %p39_p12 = scmp.ge.s32.totalorder %s1565_s26, 2  ;;  %p952_p13 = scmp.lt.s32.totalorder %s1235_s20, 4 }
  0x20   : > { %s351_s12 = sand.u32 1, %s1235_s20   ;;  %s353_s13 = sand.u32 1, %s1215_s15  }
  0x21   : > { %s1567_s26 = smov (%p39_p12, %s1565_s26), 0  ;;  %s863_s24 = sshll.u32 %s353_s13, 7 }
  0x22   : > { %s886_s25 = sshll.u32 %s1231_s19, 7  ;;  %s172_s29 = ssub.s32 %s1231_s19, %s1567_s26 }
  0x23   : > { %p173_p0 = scmp.eq.s32.totalorder %s172_s29, 0  ;;  %s360_s8 = scalar_lea.hbm %s1526_s6, %s886_s25 }
  0x24   : > { %s361_s27 = sshll.u32 %s360_s8, 4  ;;  %s355_s18 = scalar_lea.vmem [#allocation7], %s863_s24  ;;  %s362_s27 = int_to_ptr.hbm [resolvable:$true] %s361_s27 }
  0x25   : > { %s363_s10 = sshll.u32 %s355_s18, 4  ;;  %p947_p2 = pnand %p952_p13, %p1382_p11  ;;  %s364_s10 = int_to_ptr.vmem [resolvable:$true] %s363_s10 }
  0x26   : > { %s1398_s9 = scalar_select %p173_p0, %s1215_s15, %s175_s28  }
  0x27   : > { %s352_s1 = scalar_lea.sflag [#allocation8], %s351_s12  ;;  %s1548_s2 = smov 8  }
  0x28   : > { %s1549_s13 = smov 128   ;;  %381 = sbr.rel (%p1353_p5) target bundleno = 918 (0x396), region = 60 }
  0x29   : > { %949 = dma.hbm_to_vmem [thread:$0]  (!%p947_p2), %s362_s27, 2048, %s364_s10, %s352_s1, %s1549_s13, %s1549_s13, %s1548_s2  }
  0x2d   : > { %1190 = dma.done.wait (%p189_p1), [#allocation5], 2048  }
  0x2e   : > { %1192 = vsyncadd (%p189_p1), [#allocation5], 4294965248  ;;  %s388_s5 = sand.u32 1, %s1341_s21   ;;  %s390_s8 = sand.u32 1, %s1211_s14  }
  0x2f   : > { %s868_s18 = sshll.u32 %s390_s8, 7  ;;  %s389_s29 = scalar_lea.sflag [#allocation8], %s388_s5 }
  0x30   : > { %s1415_s30 = scalar_lea.vmem [#allocation7], %s868_s18 }
  0x31   : > { %1194 = dma.done.wait (%p1349_p4), %s389_s29, 2048  }
  0x32   : > { %1196 = vsyncadd (%p1349_p4), %s389_s29, 4294965248 }
  0x33   : > { %1198 = dma.done.wait (%p189_p1), [#allocation8], 2048  }
  0x34   : > { %1200 = vsyncadd (%p189_p1), [#allocation8], 4294965248  ;;  %p437_p3 = scmp.lt.s32.totalorder %s1219_s16, 1  ;;  %p441_p5 = scmp.lt.s32.totalorder %s1223_s17, 1 }
  0x35   : > { %p445_p6 = scmp.eq.s32.totalorder %s1223_s17, 0  ;;  %p446_p7 = scmp.eq.s32.totalorder %s1219_s16, 0 }
  0x36   : > { %s438_s1 = scalar_select %p437_p3, %s1219_s16, 1 }
  0x37   : > { %s1431_s2 = scalar_select %p441_p5, %s1223_s17, 1 }
  0x38   : > { %s870_s10 = sshll.u32 %s438_s1, 2  ;;  %p447_p4 = pnand %p446_p7, %p445_p6 }
  0x39   : > { %s1436_s27 = scalar_lea.vmem %s1524_s4, %s870_s10  ;;  %s443_s12 = scalar_lea.vmem %s1527_s7, %s1431_s2 }
  0x3a   : > { %450 = sbr.rel (%p447_p4) target bundleno = 316 (0x13c), region = 76 }
  0x3f   : > { %v451_v0 = vld [vmem:[%s1520_s0] sm:$0xff]  ;;  %v482_v1 = vld [vmem:[#allocation4 + $0x78] sm:$0xff]  ;;  %v1241_v2 = vmov 0   ;;  %v481_v3 = vld [vmem:[#allocation4 + $0x70] sm:$0xff]  ;;  %v453_v19 = vlaneseq  ;;  %v1242_v22 = vmov 1.0  }
  0x40   : > { %1031 = vset.pattern.permute.xlu0 %v1241_v2  ;;  %483 = vmatpush.msra.mxu0 %v482_v1  ;;  %v480_v4 = vld [vmem:[#allocation4 + $0x68] sm:$0xff]  ;;  %v479_v5 = vld [vmem:[#allocation4 + $0x60] sm:$0xff]  ;;  %v478_v6 = vld [vmem:[#allocation4 + $0x58] sm:$0xff] }
  0x41   : > { %456 = vperm.xlu0 %1031, %v451_v0   ;;  %893 = vmatpush.msra.mxu1 %v482_v1  ;;  %v452_v7 = vld [vmem:[%s1520_s0 + $0x8] sm:$0xff]  ;;  %v476_v9 = vld [vmem:[#allocation4 + $0x48] sm:$0xff]  ;;  %v475_v10 = vld [vmem:[#allocation4 + $0x40] sm:$0xff]  ;;  %v454_v20 = vand.u32 127, %v453_v19 }
  0x42   : > { %484 = vmatpush.msra.mxu0 %v481_v3  ;;  %v477_v8 = vld [vmem:[#allocation4 + $0x50] sm:$0xff]  ;;  %v474_v11 = vld [vmem:[#allocation4 + $0x38] sm:$0xff]  ;;  %v472_v13 = vld [vmem:[#allocation4 + $0x28] sm:$0xff] }
  0x43   : > { %894 = vmatpush.msra.mxu1 %v481_v3  ;;  %v473_v12 = vld [vmem:[#allocation4 + $0x30] sm:$0xff]  ;;  %v471_v14 = vld [vmem:[#allocation4 + $0x20] sm:$0xff]  ;;  %v470_v15 = vld [vmem:[#allocation4 + $0x18] sm:$0xff] }
  0x44   : > { %485 = vmatpush.msra.mxu0 %v480_v4  ;;  %v469_v16 = vld [vmem:[#allocation4 + $0x10] sm:$0xff]  ;;  %v468_v17 = vld [vmem:[#allocation4 + $0x8] sm:$0xff]  ;;  %v467_v18 = vld [vmem:[#allocation4] sm:$0xff] }
  0x45   : > { %895 = vmatpush.msra.mxu1 %v480_v4 }
  0x46   : > { %486 = vmatpush.msra.mxu0 %v479_v5 }
  0x47   : > { %896 = vmatpush.msra.mxu1 %v479_v5 }
  0x48   : > { %487 = vmatpush.msra.mxu0 %v478_v6 }
  0x49   : > { %459 = vperm.xlu0 %1031, %v452_v7   ;;  %897 = vmatpush.msra.mxu1 %v478_v6 }
  0x4a   : > { %488 = vmatpush.msra.mxu0 %v477_v8 }
  0x4b   : > { %898 = vmatpush.msra.mxu1 %v477_v8 }
  0x4c   : > { %489 = vmatpush.msra.mxu0 %v476_v9 }
  0x4d   : > { %899 = vmatpush.msra.mxu1 %v476_v9 }
  0x4e   : > { %490 = vmatpush.msra.mxu0 %v475_v10 }
  0x4f   : > { %900 = vmatpush.msra.mxu1 %v475_v10 }
  0x50   : > { %491 = vmatpush.msra.mxu0 %v474_v11 }
  0x51   : > { %901 = vmatpush.msra.mxu1 %v474_v11 }
  0x52   : > { %492 = vmatpush.msra.mxu0 %v473_v12 }
  0x53   : > { %902 = vmatpush.msra.mxu1 %v473_v12 }
  0x54   : > { %493 = vmatpush.msra.mxu0 %v472_v13 }
  0x55   : > { %903 = vmatpush.msra.mxu1 %v472_v13 }
  0x56   : > { %494 = vmatpush.msra.mxu0 %v471_v14 }
  0x57   : > { %904 = vmatpush.msra.mxu1 %v471_v14 }
  0x58   : > { %495 = vmatpush.msra.mxu0 %v470_v15 }
  0x59   : > { %905 = vmatpush.msra.mxu1 %v470_v15 }
  0x5a   : > { %496 = vmatpush.msra.mxu0 %v469_v16 }
  0x5b   : > { %906 = vmatpush.msra.mxu1 %v469_v16 }
  0x5c   : > { %497 = vmatpush.msra.mxu0 %v468_v17 }
  0x5d   : > { %907 = vmatpush.msra.mxu1 %v468_v17 }
  0x5e   : > { %498 = vmatpush.msra.mxu0 %v467_v18 }
  0x5f   : > { %908 = vmatpush.msra.mxu1 %v467_v18 }
  0xb3   : > { %v457_v21 = vpop.permute.xlu0 %456 }
  0xb4   : > { %vm461_vm0 = vcmp.eq.s32.totalorder %v454_v20, %v457_v21 }
  0xb5   : > { %873 = vmatmul.msk.f32.vlgmr.msra.gmra.mxu0 %vm461_vm0, %v1242_v22 }
  0xbb   : > { %v460_v23 = vpop.permute.xlu0 %459 }
  0xbc   : > { %vm462_vm1 = vcmp.eq.s32.totalorder %v454_v20, %v460_v23 }
  0xbd   : > { %874 = vmatmul.msk.f32.vlgmr.msra.gmra.mxu1 %vm462_vm1, %v1242_v22 }
 0x132   : > { %v500_v24 = vpop.f32.mrf.mxu0 }
 0x133   : > { %506 = vst [vmem:[#allocation2] sm:$0xff] %v500_v24 }
 0x13a   : > { %v503_v25 = vpop.f32.mrf.mxu1 }
 0x13b   : > { %507 = vst [vmem:[#allocation2 + $0x8] sm:$0xff] %v503_v25 }
 0x13c PF: > { %p875_p1 = scmp.ne.s32.totalorder %s1219_s16, 0 }
 0x13e   : > { %510 = sbr.rel (%p875_p1) target bundleno = 490 (0x1ea), region = 80 }
 0x143   : > { %v526_v26 = vld [vmem:[%s1415_s30 + $0x78] sm:$0xff]  ;;  %v525_v27 = vld [vmem:[%s1415_s30 + $0x70] sm:$0xff]  ;;  %v524_v28 = vld [vmem:[%s1415_s30 + $0x68] sm:$0xff]  ;;  %v1243_v29 = vmov 0  }
 0x144   : > { %533 = vmatpush.msra.mxu0 %v526_v26  ;;  %909 = vmatpush.msra.mxu1 %v526_v26  ;;  %v523_v30 = vld [vmem:[%s1415_s30 + $0x60] sm:$0xff]  ;;  %v558_v31 = vld [vmem:[%s1523_s3] sm:$0xff]  ;;  %v522_v32 = vld [vmem:[%s1415_s30 + $0x58] sm:$0xff] }
 0x145   : > { %1032 = vset.pattern.permute.xlu0 %v1243_v29  ;;  %v521_v33 = vld [vmem:[%s1415_s30 + $0x50] sm:$0xff]  ;;  %v520_v34 = vld [vmem:[%s1415_s30 + $0x48] sm:$0xff]  ;;  %v519_v36 = vld [vmem:[%s1415_s30 + $0x40] sm:$0xff] }
 0x146   : > { %534 = vmatpush.msra.mxu0 %v525_v27  ;;  %910 = vmatpush.msra.mxu1 %v525_v27  ;;  %v559_v35 = vld [vmem:[%s1523_s3 + $0x8] sm:$0xff]  ;;  %v518_v37 = vld [vmem:[%s1415_s30 + $0x38] sm:$0xff]  ;;  %v516_v39 = vld [vmem:[%s1415_s30 + $0x28] sm:$0xff] }
 0x147   : > { %562 = vperm.xlu0 %1032, %v558_v31   ;;  %v517_v38 = vld [vmem:[%s1415_s30 + $0x30] sm:$0xff]  ;;  %v515_v40 = vld [vmem:[%s1415_s30 + $0x20] sm:$0xff]  ;;  %v514_v41 = vld [vmem:[%s1415_s30 + $0x18] sm:$0xff] }
 0x148   : > { %535 = vmatpush.msra.mxu0 %v524_v28  ;;  %911 = vmatpush.msra.mxu1 %v524_v28  ;;  %v513_v42 = vld [vmem:[%s1415_s30 + $0x10] sm:$0xff]  ;;  %v512_v43 = vld [vmem:[%s1415_s30 + $0x8] sm:$0xff]  ;;  %v511_v44 = vld [vmem:[%s1415_s30] sm:$0xff] }
 0x149   : > { %v528_v45 = vld [vmem:[#allocation2] sm:$0xff]  ;;  %v529_v46 = vld [vmem:[#allocation2 + $0x8] sm:$0xff] }
 0x14a   : > { %536 = vmatpush.msra.mxu0 %v523_v30  ;;  %912 = vmatpush.msra.mxu1 %v523_v30  ;;  %v1033_v48 = vld [vmem:[%s443_s12] ss:$0 sm:$0xff] }
 0x14c   : > { %537 = vmatpush.msra.mxu0 %v522_v32  ;;  %913 = vmatpush.msra.mxu1 %v522_v32 }
 0x14e   : > { %538 = vmatpush.msra.mxu0 %v521_v33  ;;  %914 = vmatpush.msra.mxu1 %v521_v33 }
 0x14f   : > { %567 = vperm.xlu0 %1032, %v559_v35  }
 0x150   : > { %539 = vmatpush.msra.mxu0 %v520_v34  ;;  %915 = vmatpush.msra.mxu1 %v520_v34 }
 0x152   : > { %540 = vmatpush.msra.mxu0 %v519_v36  ;;  %916 = vmatpush.msra.mxu1 %v519_v36 }
 0x154   : > { %541 = vmatpush.msra.mxu0 %v518_v37  ;;  %917 = vmatpush.msra.mxu1 %v518_v37 }
 0x156   : > { %542 = vmatpush.msra.mxu0 %v517_v38  ;;  %918 = vmatpush.msra.mxu1 %v517_v38 }
 0x158   : > { %543 = vmatpush.msra.mxu0 %v516_v39  ;;  %919 = vmatpush.msra.mxu1 %v516_v39 }
 0x15a   : > { %544 = vmatpush.msra.mxu0 %v515_v40  ;;  %920 = vmatpush.msra.mxu1 %v515_v40 }
 0x15c   : > { %545 = vmatpush.msra.mxu0 %v514_v41  ;;  %921 = vmatpush.msra.mxu1 %v514_v41 }
 0x15e   : > { %546 = vmatpush.msra.mxu0 %v513_v42  ;;  %922 = vmatpush.msra.mxu1 %v513_v42 }
 0x160   : > { %547 = vmatpush.msra.mxu0 %v512_v43  ;;  %923 = vmatpush.msra.mxu1 %v512_v43 }
 0x162   : > { %548 = vmatpush.msra.mxu0 %v511_v44  ;;  %924 = vmatpush.msra.mxu1 %v511_v44 }
 0x163   : > { %549 = vmatmul.f32.vlgmr.msra.gmra.mxu0 %v528_v45  ;;  %552 = vmatmul.f32.vlgmr.msra.gmra.mxu1 %v529_v46 }
 0x1b9   : > { %v563_v47 = vpop.permute.xlu0 %562 }
 0x1c1   : > { %v568_v55 = vpop.permute.xlu0 %567 }
 0x1e0   : > { %v550_v49 = vpop.f32.mrf.mxu0  ;;  %v553_v50 = vpop.f32.mrf.mxu1 }
 0x1e1   : > { %v551_v51 = vadd.f32 %v1033_v48, %v550_v49  ;;  %v554_v52 = vadd.f32 %v1033_v48, %v553_v50 }
 0x1e3   : > { %v556_v53 = vmax.f32 %v551_v51, 0.0  ;;  %v557_v54 = vmax.f32 %v554_v52, 0.0 }
 0x1e5   : > { %v570_v56 = vmul.f32 %v563_v47, %v556_v53  ;;  %v571_v57 = vmul.f32 %v568_v55, %v557_v54 }
 0x1e7   : > { %v891_v58 = vpack.c.bf16 %v571_v57, %v570_v56 }
 0x1e9   : > { %892 = vst [vmem:[#allocation3] sm:$0xff] %v891_v58  }
 0x1ea PF: > { %s876_s30 = sshll.u32 %s1219_s16, 3  ;;  %v1244_v60 = vmov 0   ;;  %s1550_s28 = sld [smem:[#allocation18_spill]]  ;;  %v577_v61 = vld [vmem:[%s1436_s27] sm:$0xf]  ;;  %vm586_vm2 = vcmask 130048  }
 0x1eb   : > { %1034 = vset.pattern.permute.xlu0 %v1244_v60  ;;  %p613_p8 = scmp.eq.s32.totalorder %s1223_s17, 1  ;;  %p614_p9 = scmp.eq.s32.totalorder %s1219_s16, 1 }
 0x1ec   : > { %s611_s12 = scalar_lea.vmem [#allocation2], %s876_s30 }
 0x1ed   : > { %p615_p10 = pnand %p614_p9, %p613_p8 }
 0x1ee   : > { %s1551_s13 = sld [smem:[#allocation17_spill]] (!%p615_p10) }
 0x1ef   : > { %s1553_s18 = sld [smem:[#allocation21_spill]] (!%p615_p10) }
 0x1f0   : > { %v887_v59 = vld [vmem:[#allocation3] sm:$0xff]  ;;  %s603_s11 = scalar_lea.vmem %s1550_s28, %s876_s30 }
 0x1f1   : > { %597 = vmatpush.bf16.msra.mxu0 %v887_v59  ;;  %v604_v62 = vld [vmem:[%s603_s11] sm:$0xff] }
 0x1f2   : > { %607 = vperm.xlu0 %1034, %v604_v62  }
 0x1f4   : > { %881 = vmatmul.msk.bf16.vlgmr.msra.gmra.mxu0 %vm586_vm2, %v577_v61  ;;  %s1552_s5 = smov (!%p615_p10), %s1551_s13 }
 0x264   : > { %v608_v63 = vpop.permute.xlu0 %607 }
 0x271   : > { %v599_v0 = vpop.f32.mrf.mxu0 }
 0x272   : > { %v610_v1 = vmul.f32 %v608_v63, %v599_v0 }
 0x274   : > { %612 = vst [vmem:[%s611_s12] sm:$0xff] %v610_v1 }
 0x275   : > { %618 = sbr.rel (%p615_p10) target bundleno = 908 (0x38c), region = 84 }
 0x279   : > { %v601_v2 = vpop.f32.mrf.mxu0 }
 0x27a   : > { %v619_v3 = vld [vmem:[%s1551_s13] sm:$0xff]  ;;  %v1245_v4 = vmov 0   ;;  %v620_v7 = vld [vmem:[%s1552_s5 + $0x8] sm:$0xff]  ;;  %v715_v12 = vld [vmem:[#allocation9 + $0x78] sm:$0xff]  ;;  %v623_v50 = vlaneseq }
 0x27b   : > { %1036 = vset.pattern.permute.xlu1 %v1245_v4  ;;  %1035 = vset.pattern.permute.xlu0 %v1245_v4  ;;  %vm650_vm3 = vcmp.eq.s32.totalorder %v619_v3, 1  ;;  %vm625_vm4 = vcmp.eq.s32.totalorder %v619_v3, 0  ;;  %vm675_vm5 = vcmp.eq.s32.totalorder %v619_v3, 2  ;;  %vm651_vm6 = vcmp.eq.s32.totalorder %v620_v7, 1  ;;  %v714_v13 = vld [vmem:[#allocation9 + $0x70] sm:$0xff]  ;;  %v713_v14 = vld [vmem:[#allocation9 + $0x68] sm:$0xff] }
 0x27c   : > { %v652_v5 = vsel %vm650_vm3, 1, %v1245_v4  ;;  %v627_v6 = vsel %vm625_vm4, 1, %v1245_v4  ;;  %1037 = vset.pattern.permute.xlu2 %v1245_v4  ;;  %v677_v8 = vsel %vm675_vm5, 1, %v1245_v4  ;;  %vm626_vm7 = vcmp.eq.s32.totalorder %v620_v7, 0  ;;  %720 = vmatpush.msra.mxu0 %v715_v12  ;;  %v712_v15 = vld [vmem:[#allocation9 + $0x60] sm:$0xff]  ;;  %v711_v16 = vld [vmem:[#allocation9 + $0x58] sm:$0xff] }
 0x27d   : > { %655 = vperm.xlu1 %1036, %v652_v5   ;;  %630 = vperm.xlu0 %1035, %v627_v6   ;;  %vm676_vm8 = vcmp.eq.s32.totalorder %v620_v7, 2  ;;  %v653_v9 = vsel %vm651_vm6, 1, %v1245_v4  ;;  %v628_v10 = vsel %vm626_vm7, 1, %v1245_v4  ;;  %v710_v17 = vld [vmem:[#allocation9 + $0x50] sm:$0xff]  ;;  %v709_v18 = vld [vmem:[#allocation9 + $0x48] sm:$0xff]  ;;  %v708_v19 = vld [vmem:[#allocation9 + $0x40] sm:$0xff] }
 0x27e   : > { %680 = vperm.xlu2 %1037, %v677_v8   ;;  %v678_v11 = vsel %vm676_vm8, 1, %v1245_v4  ;;  %721 = vmatpush.msra.mxu0 %v714_v13  ;;  %v707_v20 = vld [vmem:[#allocation9 + $0x38] sm:$0xff]  ;;  %v706_v22 = vld [vmem:[#allocation9 + $0x30] sm:$0xff]  ;;  %v705_v23 = vld [vmem:[#allocation9 + $0x28] sm:$0xff]  ;;  %v624_v56 = vshrl.u32 %v623_v50, 7 }
 0x27f   : > { %v704_v24 = vld [vmem:[#allocation9 + $0x20] sm:$0xff]  ;;  %v703_v25 = vld [vmem:[#allocation9 + $0x18] sm:$0xff]  ;;  %v702_v26 = vld [vmem:[#allocation9 + $0x10] sm:$0xff] }
 0x280   : > { %722 = vmatpush.msra.mxu0 %v713_v14  ;;  %v701_v27 = vld [vmem:[#allocation9 + $0x8] sm:$0xff]  ;;  %v700_v29 = vld [vmem:[#allocation9] sm:$0xff]  ;;  %v622_v31 = vld [vmem:[#allocation2 + $0x8] sm:$0xff]  ;;  %vm646_vm15 = vcmp.eq.s32.totalorder %v624_v56, 0  ;;  %vm671_vm0 = vcmp.eq.s32.totalorder %v624_v56, 1  ;;  %vm696_vm1 = vcmp.eq.s32.totalorder %v624_v56, 2 }
 0x281   : > { %v621_v30 = vld [vmem:[#allocation2] sm:$0xff] }
 0x282   : > { %723 = vmatpush.msra.mxu0 %v712_v15  ;;  %v1038_v4 = vld [vmem:[%s1553_s18] ss:$0 sm:$0xff] }
 0x284   : > { %724 = vmatpush.msra.mxu0 %v711_v16 }
 0x285   : > { %658 = vperm.xlu1 %1036, %v653_v9   ;;  %633 = vperm.xlu0 %1035, %v628_v10  }
 0x286   : > { %683 = vperm.xlu2 %1037, %v678_v11   ;;  %725 = vmatpush.msra.mxu0 %v710_v17 }
 0x288   : > { %726 = vmatpush.msra.mxu0 %v709_v18 }
 0x28a   : > { %727 = vmatpush.msra.mxu0 %v708_v19 }
 0x28c   : > { %728 = vmatpush.msra.mxu0 %v707_v20 }
 0x28e   : > { %729 = vmatpush.msra.mxu0 %v706_v22 }
 0x290   : > { %730 = vmatpush.msra.mxu0 %v705_v23 }
 0x292   : > { %731 = vmatpush.msra.mxu0 %v704_v24 }
 0x294   : > { %732 = vmatpush.msra.mxu0 %v703_v25 }
 0x296   : > { %733 = vmatpush.msra.mxu0 %v702_v26 }
 0x298   : > { %734 = vmatpush.msra.mxu0 %v701_v27 }
 0x29a   : > { %735 = vmatpush.msra.mxu0 %v700_v29 }
 0x2d8   : > { %v681_v21 = vpop.permute.xlu2 %680 }
 0x2d9   : > { %vm685_vm9 = vcmp.eq.s32.totalorder %v681_v21, 1 }
 0x2da   : > { %v687_v32 = vsel %vm685_vm9, %v621_v30, -inf }
 0x2e0   : > { %v684_v28 = vpop.permute.xlu2 %683 }
 0x2e1   : > { %vm686_vm10 = vcmp.eq.s32.totalorder %v684_v28, 1 }
 0x2e2   : > { %v688_v33 = vsel %vm686_vm10, %v622_v31, -inf }
 0x2e3   : > { %v689_v36 = vmax.f32 %v687_v32, %v688_v33 }
 0x2e5   : > { %v690_v37 = vrot.slane %v689_v36, 4 }
 0x2e7   : > { %v691_v40 = vmax.f32 %v689_v36, %v690_v37 }
 0x2e9   : > { %v692_v47 = vrot.slane %v691_v40, 2 }
 0x2eb   : > { %v693_v53 = vmax.f32 %v691_v40, %v692_v47 }
 0x2ed   : > { %v694_v61 = vrot.slane %v693_v53, 1 }
 0x2ef   : > { %v656_v34 = vpop.permute.xlu1 %655  ;;  %v631_v35 = vpop.permute.xlu0 %630  ;;  %v695_v1 = vmax.f32 %v693_v53, %v694_v61 }
 0x2f0   : > { %vm660_vm11 = vcmp.eq.s32.totalorder %v656_v34, 1  ;;  %vm635_vm12 = vcmp.eq.s32.totalorder %v631_v35, 1 }
 0x2f1   : > { %v662_v41 = vsel %vm660_vm11, %v621_v30, -inf  ;;  %v637_v42 = vsel %vm635_vm12, %v621_v30, -inf }
 0x2f7   : > { %v659_v38 = vpop.permute.xlu1 %658  ;;  %v634_v39 = vpop.permute.xlu0 %633 }
 0x2f8   : > { %vm661_vm13 = vcmp.eq.s32.totalorder %v659_v38, 1  ;;  %vm636_vm14 = vcmp.eq.s32.totalorder %v634_v39, 1 }
 0x2f9   : > { %v663_v43 = vsel %vm661_vm13, %v622_v31, -inf  ;;  %v638_v44 = vsel %vm636_vm14, %v622_v31, -inf }
 0x2fa   : > { %v664_v45 = vmax.f32 %v662_v41, %v663_v43  ;;  %v639_v46 = vmax.f32 %v637_v42, %v638_v44 }
 0x2fc   : > { %v665_v48 = vrot.slane %v664_v45, 4  ;;  %v640_v49 = vrot.slane %v639_v46, 4 }
 0x2fe   : > { %v666_v51 = vmax.f32 %v664_v45, %v665_v48  ;;  %v641_v52 = vmax.f32 %v639_v46, %v640_v49 }
 0x300   : > { %v667_v54 = vrot.slane %v666_v51, 2  ;;  %v642_v55 = vrot.slane %v641_v52, 2 }
 0x302   : > { %v668_v57 = vmax.f32 %v666_v51, %v667_v54  ;;  %v643_v58 = vmax.f32 %v641_v52, %v642_v55 }
 0x304   : > { %v669_v59 = vrot.slane %v668_v57, 1  ;;  %v644_v60 = vrot.slane %v643_v58, 1 }
 0x306   : > { %v645_v62 = vmax.f32 %v643_v58, %v644_v60  ;;  %v670_v63 = vmax.f32 %v668_v57, %v669_v59 }
 0x308   : > { %v649_v0 = vsel %vm646_vm15, %v645_v62, 0.0 }
 0x309   : > { %v674_v2 = vsel %vm671_vm0, %v670_v63, %v649_v0 }
 0x30a   : > { %v699_v3 = vsel %vm696_vm1, %v695_v1, %v674_v2 }
 0x30b   : > { %736 = vmatmul.f32.vlgmr.msra.gmra.mxu0 %v699_v3 }
 0x388   : > { %v737_v5 = vpop.f32.mrf.mxu0 }
 0x389   : > { %v738_v6 = vadd.f32 %v1038_v4, %v737_v5 }
 0x38b   : > { %740 = vst [vmem:[#allocation10] sm:$0xff] %v738_v6 }
 0x38c PF: > { %p955_p11 = scmp.eq.s32.totalorder %s1341_s21, 3  ;;  %s1554_s10 = sld [smem:[#allocation22_spill]] }
 0x38d   : > { %s1246_s30 = smov [#allocation10]  }
 0x38e   : > { %s747_s2 = sshll.u32 %s1246_s30, 4  ;;  %s748_s2 = int_to_ptr.vmem [resolvable:$true] %s747_s2 }
 0x392   : > { %s749_s22 = sshll.u32 %s1554_s10, 4  ;;  %s750_s22 = int_to_ptr.hbm [resolvable:$true] %s749_s22 }
 0x393   : > { %936 = dma.vmem_to_hbm [thread:$0]  (%p955_p11), %s748_s2, 128, %s750_s22, [#allocation6]  }
 0x394   : > { %1202 = dma.done.wait (%p955_p11), [#allocation6], 128  }
 0x395   : > { %1204 = vsyncadd (%p955_p11), [#allocation6], 4294967168 }
 0x396 PF: > { %s25_s20 = sadd.s32 1, %s1235_s20   ;;  %s1555_s16 = sld [smem:[#allocation15_spill]] }
 0x397   : > { %p22_p12 = scmp.ge.s32.totalorder %s25_s20, 6   ;;  %s1556_s18 = sld [smem:[#allocation16_spill]] }
 0x398   : > { %s1557_s13 = smov %s1211_s14  ;;  %s1558_s14 = smov %s1215_s15 }
 0x399   : > { %s1559_s15 = smov %s1398_s9  ;;  %s1560_s17 = smov %s1231_s19 }
 0x39a   : > { %s1561_s19 = smov %s1567_s26  ;;  %24 = sbr.rel (!%p22_p12) target bundleno = 14 (0xe), region = 126 }
 0x39f   :  { %763 = vsyncpa [#allocation5], 1 }
 0x3a0   :  { %765 = vsyncpa [#allocation5 + $0x1], 1 }
 0x3a1   :  { %766 = vsyncpa [#allocation8], 1 }
 0x3a2   :  { %768 = vsyncpa [#allocation8 + $0x1], 1 }
 0x3a3   :  { %769 = vsyncpa [#allocation6], 1 }
 0x3a4   :  { %771 = vsyncpa [#allocation6 + $0x1], 1 }

</bundles_post_ra>
